<compile_context>
chip_gen: v7x
topology: tpu7x:2x2x1
jax: 0.10.0
libtpu: 0.0.40
codegen_flags: <defaults>
</compile_context>

<pallas_src>
import jax
import jax.numpy as jnp
from jax.experimental import pallas as pl
from jax.experimental.pallas import tpu as pltpu

_LANES = 128
_ROW_ALIGN = 16          # sublane multiple friendly to the bf16 label blocks
_NUM_SPLITS = 2          # leading "parallel" axis -> independent partial sums
                         # (one per v7x TensorCore; near-free on 1-TC chips
                         # since the resident accumulator is only 8x128)
_MAX_TILE_ROWS = 2048    # 2048*128 elems/tile * 12 B ~= 3 MiB per step,
                         # ~6 MiB double-buffered: fits v5e/v6e/v7x easily.


def _cdiv(a, b):
    return -(-a // b)


def _round_up(a, b):
    return _cdiv(a, b) * b


def _uplift_loss_kernel(p_ctr_ref, p_cvr_ref, click_ref, conv_ref, out_ref):
    """One batch tile: two-term BCE on the pre-selected arm, accumulate.

    p_ctr_ref / p_cvr_ref : [tile_rows, 128] f32   assigned-arm predictions
    click_ref / conv_ref  : [tile_rows, 128] bf16  labels (0 for masked rows)
    out_ref               : [8, 128] f32           resident per-split accumulator
    """
    @pl.when(pl.program_id(1) == 0)
    def _init():
        out_ref[...] = jnp.zeros_like(out_ref)

    p_ctr = p_ctr_ref[...]                          # already f32
    p_cvr = p_cvr_ref[...]
    click = click_ref[...].astype(jnp.float32)
    conv = conv_ref[...].astype(jnp.float32)

    def bce(p, y):
        # matches torch.nn.BCELoss: log terms clamped at -100 (so bce(0,0)=0)
        logp = jnp.maximum(jnp.log(p), -100.0)
        log1mp = jnp.maximum(jnp.log(1.0 - p), -100.0)
        return -(y * logp + (1.0 - y) * log1mp)

    click_mask = (click == 1.0).astype(jnp.float32)
    loss = bce(p_ctr, click) + bce(p_cvr, conv) * click_mask

    # sublane-reduce to one vreg before accumulating: the resident accumulator
    # is 8x128 regardless of tile_rows (1 vld + 1 vst instead of tile_rows/8).
    tile_rows = loss.shape[0]
    out_ref[...] += jnp.sum(loss.reshape(tile_rows // 8, 8, _LANES), axis=0)


def uplift_loss(ctr_control, ctr_treatment, ctcvr_control, ctcvr_treatment,
                click, conversion, treatment):
    """Pallas wrapper matching UpliftLoss.forward semantics."""
    batch = click.shape[0]
    n_arms = ctr_treatment.shape[1] + 1              # treatment_count

    # ---- wrapper: per-row arm selection + validity masking (fused XLA
    # elementwise pass, no transpose copy).  Only the selected column of each
    # head ever reaches the kernel. ------------------------------------------
    t = treatment.reshape(-1).astype(jnp.int32)
    valid = (t >= 0) & (t < n_arms)                   # reference skips others
    sel_ctr = ctr_control.reshape(-1).astype(jnp.float32)
    sel_cvr = ctcvr_control.reshape(-1).astype(jnp.float32)
    for k in range(1, n_arms):
        arm = t == k
        sel_ctr = jnp.where(arm, ctr_treatment[:, k - 1].astype(jnp.float32),
                            sel_ctr)
        sel_cvr = jnp.where(arm, ctcvr_treatment[:, k - 1].astype(jnp.float32),
                            sel_cvr)
    zero = jnp.float32(0.0)
    # invalid rows: p=0 and y=0  ->  bce(0, 0) == 0 (clamped logs), so they
    # contribute nothing, matching the reference which skips unmatched rows.
    sel_ctr = jnp.where(valid, sel_ctr, zero)
    sel_cvr = jnp.where(valid, sel_cvr, zero)
    # labels narrowed to bf16 (exact for 0/1 hard labels); predictions stay
    # f32 so the log() matches the f32 reference bit-for-bit in value range.
    click_m = jnp.where(valid, click.reshape(-1).astype(jnp.float32),
                        zero).astype(jnp.bfloat16)
    conv_m = jnp.where(valid, conversion.reshape(-1).astype(jnp.float32),
                       zero).astype(jnp.bfloat16)

    # ---- lane-dense layout: batch -> (rows, 128), padded only up to the grid
    # coverage (bounded by one tile per split; fill 0 contributes 0 loss). ---
    rows = _cdiv(batch, _LANES)
    rows_per_split = _cdiv(rows, _NUM_SPLITS)
    tile_rows = min(_MAX_TILE_ROWS, _round_up(rows_per_split, _ROW_ALIGN))
    tiles_per_split = _cdiv(rows_per_split, tile_rows)
    rows_padded = _NUM_SPLITS * tiles_per_split * tile_rows
    pad = rows_padded * _LANES - batch

    def lay(x):
        x = jnp.pad(x, (0, pad))                      # constant 0 fill
        return x.reshape(rows_padded, _LANES)

    p_ctr = lay(sel_ctr)
    p_cvr = lay(sel_cvr)
    click2 = lay(click_m)
    conv2 = lay(conv_m)

    vec_spec = pl.BlockSpec((tile_rows, _LANES),
                            lambda c, tt: (c * tiles_per_split + tt, 0))
    out_spec = pl.BlockSpec((8, _LANES), lambda c, tt: (c, 0))

    partials = pl.pallas_call(
        _uplift_loss_kernel,
        out_shape=jax.ShapeDtypeStruct((_NUM_SPLITS * 8, _LANES), jnp.float32),
        grid=(_NUM_SPLITS, tiles_per_split),
        in_specs=[vec_spec, vec_spec, vec_spec, vec_spec],
        out_specs=out_spec,
        compiler_params=pltpu.CompilerParams(
            dimension_semantics=("parallel", "arbitrary"),
            vmem_limit_bytes=32 * 1024 * 1024),
    )(p_ctr, p_cvr, click2, conv2)

    # tiny epilogue: fold the two 8x128 per-split accumulators and normalize
    return jnp.sum(partials) / batch


def _reference_loss(ctr_control, ctr_treatment, ctcvr_control, ctcvr_treatment,
                    click, conversion, treatment):
    """Pure-JAX reference mirroring the PyTorch module literally."""
    batch = click.shape[0]
    n_arms = ctr_treatment.shape[1] + 1
    click = click.reshape(-1, 1)
    conversion = conversion.reshape(-1, 1)

    def bce(p, y):
        logp = jnp.maximum(jnp.log(p), -100.0)
        log1mp = jnp.maximum(jnp.log(1.0 - p), -100.0)
        return -(y * logp + (1.0 - y) * log1mp)

    control_mask = (treatment == 0).astype(jnp.float32).reshape(-1, 1)
    click_mask = (click == 1.0).astype(jnp.float32)

    total = jnp.sum(bce(ctr_control, click) * control_mask)
    total += jnp.sum(bce(ctcvr_control, conversion) * control_mask * click_mask)
    for i in range(1, n_arms):
        t_mask = (treatment == i).astype(jnp.float32).reshape(-1, 1)
        total += jnp.sum(bce(ctr_treatment[:, i - 1:i], click) * t_mask)
        total += jnp.sum(
            bce(ctcvr_treatment[:, i - 1:i], conversion) * t_mask * click_mask)
    return total / batch


if __name__ == "__main__":
    key = jax.random.PRNGKey(0)
    batch = 8
    treatment_count = 4  # 1 control arm + 3 treatment arms

    k1, k2, k3, k4, k5, k6, k7 = jax.random.split(key, 7)

    # predictions are probabilities in (0, 1)
    ctr_control = jax.nn.sigmoid(jax.random.normal(k1, (batch, 1)))
    ctr_treatment = jax.nn.sigmoid(
        jax.random.normal(k2, (batch, treatment_count - 1)))
    ctcvr_control = jax.nn.sigmoid(jax.random.normal(k3, (batch, 1)))
    ctcvr_treatment = jax.nn.sigmoid(
        jax.random.normal(k4, (batch, treatment_count - 1)))

    click = jax.random.bernoulli(k5, 0.5, (batch,)).astype(jnp.float32)
    conversion = jax.random.bernoulli(k6, 0.3, (batch,)).astype(jnp.float32)
    treatment = jax.random.randint(k7, (batch,), 0, treatment_count,
                                   dtype=jnp.int32)

    loss = uplift_loss(ctr_control, ctr_treatment, ctcvr_control,
                       ctcvr_treatment, click, conversion, treatment)
    loss = jax.block_until_ready(loss)

    ref = _reference_loss(ctr_control, ctr_treatment, ctcvr_control,
                          ctcvr_treatment, click, conversion, treatment)
    assert jnp.allclose(loss, ref, rtol=1e-5, atol=1e-5), (loss, ref)

    print("KERNEL_OK")
</pallas_src>

<mosaic_0001>
module attributes {stable_mosaic.version = 11 : i64} {
  func.func @_uplift_loss_kernel(%arg0: i32, %arg1: i32, %arg2: memref<16x128xf32, #tpu.memory_space<vmem>>, %arg3: memref<16x128xf32, #tpu.memory_space<vmem>>, %arg4: memref<16x128xbf16, #tpu.memory_space<vmem>>, %arg5: memref<16x128xbf16, #tpu.memory_space<vmem>>, %arg6: memref<8x128xf32, #tpu.memory_space<vmem>>) attributes {dimension_semantics = [#tpu.dimension_semantics<parallel>, #tpu.dimension_semantics<arbitrary>], iteration_bounds = array<i64: 2, 1>, scalar_prefetch = 0 : i64, scratch_operands = 0 : i64, tpu.core_type = #tpu.core_type<tc>, window_params = [{transform_indices = @transform_0, window_bounds = array<i64: 16, 128>}, {transform_indices = @transform_1, window_bounds = array<i64: 16, 128>}, {transform_indices = @transform_2, window_bounds = array<i64: 16, 128>}, {transform_indices = @transform_3, window_bounds = array<i64: 16, 128>}, {transform_indices = @transform_4, window_bounds = array<i64: 8, 128>}]} {
    %c0_i32 = arith.constant 0 : i32
    %0 = arith.cmpi eq, %arg1, %c0_i32 : i32
    %1 = arith.extui %0 : i1 to i32
    %c0_i32_0 = arith.constant 0 : i32
    %2 = arith.cmpi ne, %1, %c0_i32_0 : i32
    scf.if %2 {
      %cst_23 = arith.constant 0.000000e+00 : f32
      %50 = vector.broadcast %cst_23 : f32 to vector<8x128xf32>
      %c0_24 = arith.constant 0 : index
      %c0_25 = arith.constant 0 : index
      %51 = vector.load %arg6[%c0_24, %c0_25] : memref<8x128xf32, #tpu.memory_space<vmem>>, vector<8x128xf32>
      tpu.vector_store %arg6[%c0_24, %c0_25], %50 {strides = array<i32>} : memref<8x128xf32, #tpu.memory_space<vmem>>, vector<8x128xf32>,
    } else {
    }
    %c0 = arith.constant 0 : index
    %c0_1 = arith.constant 0 : index
    %3 = vector.load %arg2[%c0, %c0_1] : memref<16x128xf32, #tpu.memory_space<vmem>>, vector<16x128xf32>
    %c0_2 = arith.constant 0 : index
    %c0_3 = arith.constant 0 : index
    %4 = vector.load %arg3[%c0_2, %c0_3] : memref<16x128xf32, #tpu.memory_space<vmem>>, vector<16x128xf32>
    %c0_4 = arith.constant 0 : index
    %c0_5 = arith.constant 0 : index
    %5 = vector.load %arg4[%c0_4, %c0_5] : memref<16x128xbf16, #tpu.memory_space<vmem>>, vector<16x128xbf16>
    %6 = arith.extf %5 : vector<16x128xbf16> to vector<16x128xf32>
    %c0_6 = arith.constant 0 : index
    %c0_7 = arith.constant 0 : index
    %7 = vector.load %arg5[%c0_6, %c0_7] : memref<16x128xbf16, #tpu.memory_space<vmem>>, vector<16x128xbf16>
    %8 = arith.extf %7 : vector<16x128xbf16> to vector<16x128xf32>
    %cst = arith.constant 1.000000e+00 : f32
    %9 = vector.broadcast %cst : f32 to vector<16x128xf32>
    %10 = arith.cmpf oeq, %6, %9 : vector<16x128xf32>
    %11 = arith.extui %10 : vector<16x128xi1> to vector<16x128xi32>
    %12 = arith.sitofp %11 : vector<16x128xi32> to vector<16x128xf32>
    %13 = math.log %3 : vector<16x128xf32>
    %cst_8 = arith.constant -1.000000e+02 : f32
    %14 = vector.broadcast %cst_8 : f32 to vector<16x128xf32>
    %15 = arith.maximumf %13, %14 : vector<16x128xf32>
    %cst_9 = arith.constant 1.000000e+00 : f32
    %16 = vector.broadcast %cst_9 : f32 to vector<16x128xf32>
    %17 = arith.subf %16, %3 : vector<16x128xf32>
    %18 = math.log %17 : vector<16x128xf32>
    %cst_10 = arith.constant -1.000000e+02 : f32
    %19 = vector.broadcast %cst_10 : f32 to vector<16x128xf32>
    %20 = arith.maximumf %18, %19 : vector<16x128xf32>
    %21 = arith.mulf %6, %15 : vector<16x128xf32>
    %cst_11 = arith.constant 1.000000e+00 : f32
    %22 = vector.broadcast %cst_11 : f32 to vector<16x128xf32>
    %23 = arith.subf %22, %6 : vector<16x128xf32>
    %24 = arith.mulf %23, %20 : vector<16x128xf32>
    %25 = arith.addf %21, %24 : vector<16x128xf32>
    %cst_12 = arith.constant 0.000000e+00 : f32
    %26 = vector.broadcast %cst_12 : f32 to vector<16x128xf32>
    %27 = arith.subf %26, %25 : vector<16x128xf32>
    %28 = math.log %4 : vector<16x128xf32>
    %cst_13 = arith.constant -1.000000e+02 : f32
    %29 = vector.broadcast %cst_13 : f32 to vector<16x128xf32>
    %30 = arith.maximumf %28, %29 : vector<16x128xf32>
    %cst_14 = arith.constant 1.000000e+00 : f32
    %31 = vector.broadcast %cst_14 : f32 to vector<16x128xf32>
    %32 = arith.subf %31, %4 : vector<16x128xf32>
    %33 = math.log %32 : vector<16x128xf32>
    %cst_15 = arith.constant -1.000000e+02 : f32
    %34 = vector.broadcast %cst_15 : f32 to vector<16x128xf32>
    %35 = arith.maximumf %33, %34 : vector<16x128xf32>
    %36 = arith.mulf %8, %30 : vector<16x128xf32>
    %cst_16 = arith.constant 1.000000e+00 : f32
    %37 = vector.broadcast %cst_16 : f32 to vector<16x128xf32>
    %38 = arith.subf %37, %8 : vector<16x128xf32>
    %39 = arith.mulf %38, %35 : vector<16x128xf32>
    %40 = arith.addf %36, %39 : vector<16x128xf32>
    %cst_17 = arith.constant 0.000000e+00 : f32
    %41 = vector.broadcast %cst_17 : f32 to vector<16x128xf32>
    %42 = arith.subf %41, %40 : vector<16x128xf32>
    %43 = arith.mulf %42, %12 : vector<16x128xf32>
    %44 = arith.addf %27, %43 : vector<16x128xf32>
    %c0_18 = arith.constant 0 : index
    %c0_19 = arith.constant 0 : index
    %45 = vector.load %arg6[%c0_18, %c0_19] : memref<8x128xf32, #tpu.memory_space<vmem>>, vector<8x128xf32>
    %46 = vector.shape_cast %44 : vector<16x128xf32> to vector<2x8x128xf32>
    %cst_20 = arith.constant dense<0.000000e+00> : vector<8x128xf32>
    %47 = vector.multi_reduction <add>, %46, %cst_20 [0] : vector<2x8x128xf32> to vector<8x128xf32>
    %48 = arith.addf %45, %47 : vector<8x128xf32>
    %c0_21 = arith.constant 0 : index
    %c0_22 = arith.constant 0 : index
    %49 = vector.load %arg6[%c0_21, %c0_22] : memref<8x128xf32, #tpu.memory_space<vmem>>, vector<8x128xf32>
    tpu.vector_store %arg6[%c0_21, %c0_22], %48 {strides = array<i32>} : memref<8x128xf32, #tpu.memory_space<vmem>>, vector<8x128xf32>,
    return
  }
  func.func @transform_0(%arg0: i32, %arg1: i32) -> (i32, i32) {
    %c1_i32 = arith.constant 1 : i32
    %0 = arith.muli %arg0, %c1_i32 : i32
    %1 = arith.addi %0, %arg1 : i32
    %c0_i32 = arith.constant 0 : i32
    %c0_i32_0 = arith.constant 0 : i32
    return %1, %c0_i32 : i32, i32
  }
  func.func @transform_1(%arg0: i32, %arg1: i32) -> (i32, i32) {
    %c1_i32 = arith.constant 1 : i32
    %0 = arith.muli %arg0, %c1_i32 : i32
    %1 = arith.addi %0, %arg1 : i32
    %c0_i32 = arith.constant 0 : i32
    %c0_i32_0 = arith.constant 0 : i32
    return %1, %c0_i32 : i32, i32
  }
  func.func @transform_2(%arg0: i32, %arg1: i32) -> (i32, i32) {
    %c1_i32 = arith.constant 1 : i32
    %0 = arith.muli %arg0, %c1_i32 : i32
    %1 = arith.addi %0, %arg1 : i32
    %c0_i32 = arith.constant 0 : i32
    %c0_i32_0 = arith.constant 0 : i32
    return %1, %c0_i32 : i32, i32
  }
  func.func @transform_3(%arg0: i32, %arg1: i32) -> (i32, i32) {
    %c1_i32 = arith.constant 1 : i32
    %0 = arith.muli %arg0, %c1_i32 : i32
    %1 = arith.addi %0, %arg1 : i32
    %c0_i32 = arith.constant 0 : i32
    %c0_i32_0 = arith.constant 0 : i32
    return %1, %c0_i32 : i32, i32
  }
  func.func @transform_4(%arg0: i32, %arg1: i32) -> (i32, i32) {
    %c0_i32 = arith.constant 0 : i32
    %c0_i32_0 = arith.constant 0 : i32
    return %arg0, %c0_i32 : i32, i32
  }
}

</mosaic_0001>

<bundles_post_ra>
// kernel: tpu_custom_call.1
= control target key start
LH: loop header
LB: loop body
LE: loop exit
PB: predicated region body
PF: predicated region fallthrough
CT: control target
= control target key end

     0   :  { %s1319_s0 = inlined_call_operand.hbm [shape: f32[32,128], index: 0, kind: input, shape index: {}]   ;;  %s1320_s1 = inlined_call_operand.hbm [shape: f32[32,128], index: 1, kind: input, shape index: {}]   ;;  %s1321_s2 = inlined_call_operand.hbm [shape: bf16[32,128], index: 2, kind: input, shape index: {}]   ;;  %s1322_s3 = inlined_call_operand.hbm [shape: bf16[32,128], index: 3, kind: input, shape index: {}]   ;;  %s1323_s4 = inlined_call_operand.hbm [shape: f32[16,128], index: 4, kind: output, shape index: {}]  }
   0x1   :  { %1330 = sst [smem:[#allocation17_spill]] %s1319_s0 }
   0x2   :  { %1331 = sst [smem:[#allocation18_spill]] %s1320_s1 }
   0x3   :  { %9 = vsyncpa [#allocation3], 0 }
   0x4   :  { %11 = vsyncpa [#allocation3 + $0x1], 0 }
   0x5   :  { %12 = vsyncpa [#allocation6], 0 }
   0x6   :  { %14 = vsyncpa [#allocation6 + $0x1], 0 }
   0x7   :  { %15 = vsyncpa [#allocation9], 0 }
   0x8   :  { %17 = vsyncpa [#allocation9 + $0x1], 0 }
   0x9   :  { %18 = vsyncpa [#allocation4], 0 }
   0xa   :  { %20 = vsyncpa [#allocation4 + $0x1], 0  ;;  %s991_s15 = smov 0   ;;  %s993_s16 = smov 0  }
   0xb   :  { %s995_s17 = smov 0   ;;  %s997_s18 = smov 0  }
   0xc   :  { %s999_s19 = smov 0   ;;  %s1001_s20 = smov 0  }
   0xd LB: > { %s1022_s21 = sadd.s32 4294967295, %s954_s20   ;;  %s607_s22 = sadd.s32 4294967294, %s954_s20   ;;  %s954_s20 = sphi %s1001_s20, %s26_s20   ;;  %s950_s19 = sphi %s999_s19, %s1359_s19   ;;  %s946_s18 = sphi %s997_s18, %s1358_s18   ;;  %s942_s17 = sphi %s995_s17, %s1357_s17   ;;  %s938_s16 = sphi %s993_s16, %s1356_s16   ;;  %s934_s15 = sphi %s991_s15, %s1355_s15  }
   0xe   : > { %s38_s23 = sadd.s32 1, %s950_s19  ;;  %s47_s24 = sadd.s32 1, %s942_s17 }
   0xf   : > { %p40_p0 = scmp.ge.s32.totalorder %s38_s23, 2  ;;  %p54_p1 = scmp.ne.s32.totalorder %s942_s17, %s938_s16 }
  0x10   : > { %p55_p2 = scmp.eq.s32.totalorder %s954_s20, 0  ;;  %p60_p3 = scmp.ne.s32.totalorder %s938_s16, %s934_s15 }
  0x11   : > { %s1361_s23 = smov (%p40_p0, %s38_s23), 0  ;;  %p61_p5 = scmp.eq.s32.totalorder %s1022_s21, 0 }
  0x12   : > { %1332 = sst [smem:[#allocation15_spill]] %s1361_s23  ;;  %p1034_p4 = por %p55_p2, %p54_p1 }
  0x13   : > { %s44_s26 = ssub.s32 %s950_s19, %s1361_s23  ;;  %p168_p6 = scmp.eq.s32.totalorder %s1022_s21, 1 }
  0x14   : > { %p45_p7 = scmp.eq.s32.totalorder %s44_s26, 0  ;;  %p1042_p8 = por %p61_p5, %p60_p3 }
  0x15   : > { %p1046_p9 = por %p168_p6, %p54_p1  ;;  %p174_p10 = scmp.eq.s32.totalorder %s607_s22, 1 }
  0x16   : > { %s1334_s27 = scalar_select %p1042_p8, 1, 0 }
  0x17   : > { %s1335_s28 = scalar_select %p1046_p9, 1, 0 }
  0x18   : > { %s1051_s29 = scalar_select %p45_p7, %s942_s17, %s47_s24  }
  0x19   : > { %p1053_p11 = por %p174_p10, %p60_p3  ;;  %p673_p13 = scmp.lt.s32.totalorder %s954_s20, 2 }
  0x1a   : > { %1336 = sst [smem:[#allocation16_spill]] %s1051_s29  ;;  %s1060_s5 = sand.u32 1, %s942_s17  }
  0x1b   : > { %s1337_s30 = scalar_select %p1053_p11, 1, 0 }
  0x1c   : > { %s1324_s6 = sshll.u32 %s1060_s5, 4  ;;  %s634_s7 = sshll.u32 %s950_s19, 8 }
  0x1d   : > { %p1066_p0 = pnand %p673_p13, %p1034_p4  ;;  %s216_s9 = sand.u32 1, %s954_s20  }
  0x1e   : > { %s1339_s1 = sld [smem:[#allocation18_spill]]  ;;  %s220_s13 = scalar_lea.vmem [#allocation5], %s1324_s6 }
  0x1f   : > { %s228_s14 = sshll.u32 %s220_s13, 4  ;;  %s1084_s22 = scalar_lea.sflag [#allocation6], %s216_s9  ;;  %s1081_s14 = int_to_ptr.vmem [resolvable:$true] %s228_s14 }
  0x20   : > { %p1090_p4 = pneg %p1066_p0 }
  0x24   : > { %s1076_s12 = scalar_lea.hbm %s1339_s1, %s634_s7  ;;  %s749_s11 = scalar_lea.hbm %s1339_s1, 512 }
  0x25   : > { %s744_s24 = scalar_lea.hbm %s1076_s12, 256  ;;  %p750_p7 = scmp.lt.u32.totalorder %s1076_s12, %s1339_s1 }
  0x26   : > { %p745_p3 = scmp.ne.s32.totalorder %s1076_s12, %s744_s24  ;;  %p751_p10 = scmp.lt.u32.totalorder %s749_s11, %s744_s24 }
  0x27   : > { %p753_p12 = scmp.lt.u32.totalorder %s744_s24, %s1076_s12 }
  0x28   : > { %p747_p5 = pnand %p1090_p4, %p745_p3  ;;  %p752_p13 = por %p751_p10, %p750_p7 }
  0x2a   : > { %p748_p6 = pneg %p747_p5  ;;  %p754_p1 = por %p753_p12, %p752_p13 }
  0x2c   : > { %p755_p2 = pnand %p754_p1, %p748_p6 }
  0x2e   : > { %758 = shalt.err (!%p755_p2)
}
  0x2f   : > { %s759_s9 = scalar_lea.vmem %s1081_s14, 256  ;;  %s956_s26 = smov [#allocation5]  }
  0x30   : > { %p760_p3 = scmp.ne.s32.totalorder %s1081_s14, %s759_s9  ;;  %s764_s10 = sshll.u32 %s956_s26, 4  ;;  %s765_s10 = int_to_ptr.vmem [resolvable:$false] %s764_s10 }
  0x31   : > { %s766_s6 = scalar_lea.vmem %s765_s10, 512  ;;  %p767_p9 = scmp.lt.s32.totalorder %s1081_s14, %s765_s10 }
  0x32   : > { %p762_p5 = pnand %p760_p3, %p1090_p4  ;;  %p768_p8 = scmp.lt.s32.totalorder %s766_s6, %s759_s9 }
  0x34   : > { %p763_p11 = pneg %p762_p5  ;;  %p769_p7 = por %p768_p8, %p767_p9 }
  0x36   : > { %p770_p10 = pnand %p769_p7, %p763_p11 }
  0x38   : > { %773 = shalt.err (!%p770_p10)
}
  0x39   : > { %s1328_s24 = smov 128   ;;  %s1329_s11 = smov 8  }
  0x3a   : > { %662 = dma.hbm_to_vmem [thread:$0]  (!%p1066_p0), %s1076_s12, 256, %s1081_s14, %s1084_s22, %s1328_s24, %s1328_s24, %s1329_s11  }
  0x3b   : > { %p1341_p8 = scmp.lt.s32.totalorder %s954_s20, 3  ;;  %p1342_p9 = scmp.ge.s32.totalorder %s954_s20, 1 }
  0x3c   : > { %s1344_s0 = sld [smem:[#allocation17_spill]]  ;;  %s1345_s6 = sshll.u32 %s1060_s5, 4 }
  0x3d   : > { %p1121_p11 = pnand %p1342_p9, %p1341_p8  ;;  %s198_s1 = scalar_lea.vmem [#allocation2], %s1345_s6 }
  0x3e   : > { %s206_s23 = sshll.u32 %s198_s1, 4  ;;  %s616_s12 = sshll.u32 %s1060_s5, 3  ;;  %s1135_s23 = int_to_ptr.vmem [resolvable:$true] %s206_s23 }
  0x3f   : > { %s1343_s13 = scalar_select %p1121_p11, 1, 0 }
  0x40   : > { %s195_s14 = scalar_lea.sflag [#allocation3], %s1060_s5 }
  0x42   : > { %s1130_s10 = scalar_lea.hbm %s1344_s0, %s634_s7  ;;  %s779_s7 = scalar_lea.hbm %s1344_s0, 512 }
  0x43   : > { %s774_s24 = scalar_lea.hbm %s1130_s10, 256  ;;  %p780_p6 = scmp.lt.u32.totalorder %s1130_s10, %s1344_s0 }
  0x44   : > { %p775_p12 = scmp.ne.s32.totalorder %s1130_s10, %s774_s24  ;;  %p781_p13 = scmp.lt.u32.totalorder %s779_s7, %s774_s24 }
  0x45   : > { %p783_p5 = scmp.lt.u32.totalorder %s774_s24, %s1130_s10 }
  0x46   : > { %p777_p1 = pnand %p775_p12, %p1090_p4  ;;  %p782_p3 = por %p781_p13, %p780_p6 }
  0x48   : > { %p778_p2 = pneg %p777_p1  ;;  %p784_p7 = por %p783_p5, %p782_p3 }
  0x4a   : > { %p785_p10 = pnand %p784_p7, %p778_p2 }
  0x4c   : > { %788 = shalt.err (!%p785_p10)
}
  0x4d   : > { %s789_s1 = scalar_lea.vmem %s1135_s23, 256  ;;  %s959_s11 = smov [#allocation2]  }
  0x4e   : > { %p790_p8 = scmp.ne.s32.totalorder %s1135_s23, %s789_s1  ;;  %s794_s6 = sshll.u32 %s959_s11, 4  ;;  %s795_s6 = int_to_ptr.vmem [resolvable:$false] %s794_s6 }
  0x4f   : > { %s796_s29 = scalar_lea.vmem %s795_s6, 512  ;;  %p797_p1 = scmp.lt.s32.totalorder %s1135_s23, %s795_s6 }
  0x50   : > { %p792_p9 = pnand %p790_p8, %p1090_p4  ;;  %p798_p11 = scmp.lt.s32.totalorder %s796_s29, %s789_s1 }
  0x52   : > { %p793_p12 = pneg %p792_p9  ;;  %p799_p6 = por %p798_p11, %p797_p1 }
  0x54   : > { %p800_p13 = pnand %p799_p6, %p793_p12 }
  0x56   : > { %803 = shalt.err (!%p800_p13)
}
  0x57   : > { %s1346_s24 = smov 8   ;;  %s1347_s9 = smov 128  }
  0x58   : > { %659 = dma.hbm_to_vmem [thread:$0]  (!%p1066_p0), %s1130_s10, 256, %s1135_s23, %s195_s14, %s1347_s9, %s1347_s9, %s1346_s24  }
  0x59   : > { %s636_s7 = sshll.u32 %s950_s19, 7  ;;  %s242_s26 = scalar_lea.vmem [#allocation7], %s616_s12 }
  0x5a   : > { %s250_s1 = sshll.u32 %s242_s26, 4  ;;  %s1172_s29 = scalar_lea.hbm %s1321_s2, %s636_s7  ;;  %s1174_s1 = int_to_ptr.vmem [resolvable:$true] %s250_s1 }
  0x5b   : > { %s804_s0 = scalar_lea.hbm %s1172_s29, 128  ;;  %s809_s14 = scalar_lea.hbm %s1321_s2, 256 }
  0x5c   : > { %p805_p11 = scmp.ne.s32.totalorder %s1172_s29, %s804_s0  ;;  %p810_p5 = scmp.lt.u32.totalorder %s1172_s29, %s1321_s2 }
  0x5d   : > { %p811_p7 = scmp.lt.u32.totalorder %s809_s14, %s804_s0  ;;  %p813_p8 = scmp.lt.u32.totalorder %s804_s0, %s1172_s29 }
  0x5e   : > { %p807_p2 = pnand %p805_p11, %p1090_p4 }
  0x5f   : > { %p812_p10 = por %p811_p7, %p810_p5 }
  0x60   : > { %p808_p3 = pneg %p807_p2 }
  0x61   : > { %p814_p9 = por %p813_p8, %p812_p10 }
  0x63   : > { %p815_p12 = pnand %p814_p9, %p808_p3 }
  0x65   : > { %818 = shalt.err (!%p815_p12)
}
  0x66   : > { %s819_s26 = scalar_lea.vmem %s1174_s1, 128  ;;  %s960_s11 = smov [#allocation7]  }
  0x67   : > { %p820_p1 = scmp.ne.s32.totalorder %s1174_s1, %s819_s26  ;;  %s824_s6 = sshll.u32 %s960_s11, 4  ;;  %s825_s6 = int_to_ptr.vmem [resolvable:$false] %s824_s6 }
  0x68   : > { %s826_s23 = scalar_lea.vmem %s825_s6, 256  ;;  %p827_p11 = scmp.lt.s32.totalorder %s1174_s1, %s825_s6 }
  0x69   : > { %p822_p6 = pnand %p820_p1, %p1090_p4  ;;  %p828_p2 = scmp.lt.s32.totalorder %s826_s23, %s819_s26 }
  0x6b   : > { %p823_p13 = pneg %p822_p6  ;;  %p829_p5 = por %p828_p2, %p827_p11 }
  0x6d   : > { %p830_p7 = pnand %p829_p5, %p823_p13 }
  0x6f   : > { %833 = shalt.err (!%p830_p7)
}
  0x70   : > { %s961_s0 = smov 64   ;;  %s962_s10 = smov 4  }
  0x71   : > { %665 = dma.hbm_to_vmem [thread:$0]  (!%p1066_p0), %s1172_s29, 128, %s1174_s1, %s1084_s22, %s961_s0, %s961_s0, %s962_s10  }
  0x72   : > { %s1206_s9 = scalar_lea.hbm %s1322_s3, %s636_s7  ;;  %s264_s26 = scalar_lea.vmem [#allocation8], %s616_s12 }
  0x73   : > { %s272_s11 = sshll.u32 %s264_s26, 4  ;;  %s261_s6 = scalar_lea.sflag [#allocation9], %s1060_s5  ;;  %s1210_s11 = int_to_ptr.vmem [resolvable:$true] %s272_s11 }
  0x74   : > { %s834_s23 = scalar_lea.hbm %s1206_s9, 128  ;;  %s839_s7 = scalar_lea.hbm %s1322_s3, 256 }
  0x75   : > { %p835_p3 = scmp.ne.s32.totalorder %s1206_s9, %s834_s23  ;;  %p840_p9 = scmp.lt.u32.totalorder %s1206_s9, %s1322_s3 }
  0x76   : > { %p841_p12 = scmp.lt.u32.totalorder %s839_s7, %s834_s23  ;;  %p843_p6 = scmp.lt.u32.totalorder %s834_s23, %s1206_s9 }
  0x77   : > { %p837_p10 = pnand %p835_p3, %p1090_p4 }
  0x78   : > { %p842_p1 = por %p841_p12, %p840_p9 }
  0x79   : > { %p838_p8 = pneg %p837_p10 }
  0x7a   : > { %p844_p13 = por %p843_p6, %p842_p1 }
  0x7c   : > { %p845_p11 = pnand %p844_p13, %p838_p8 }
  0x7e   : > { %848 = shalt.err (!%p845_p11)
}
  0x7f   : > { %s849_s12 = scalar_lea.vmem %s1210_s11, 128  ;;  %s963_s24 = smov [#allocation8]  }
  0x80   : > { %p850_p2 = scmp.ne.s32.totalorder %s1210_s11, %s849_s12  ;;  %s854_s26 = sshll.u32 %s963_s24, 4  ;;  %s855_s26 = int_to_ptr.vmem [resolvable:$false] %s854_s26 }
  0x81   : > { %s856_s22 = scalar_lea.vmem %s855_s26, 256  ;;  %p857_p3 = scmp.lt.s32.totalorder %s1210_s11, %s855_s26 }
  0x82   : > { %p852_p5 = pnand %p850_p2, %p1090_p4  ;;  %p858_p10 = scmp.lt.s32.totalorder %s856_s22, %s849_s12 }
  0x84   : > { %p853_p7 = pneg %p852_p5  ;;  %p859_p9 = por %p858_p10, %p857_p3 }
  0x86   : > { %p860_p12 = pnand %p859_p9, %p853_p7 }
  0x88   : > { %863 = shalt.err (!%p860_p12)
}
  0x89   : > { %668 = dma.hbm_to_vmem [thread:$0]  (!%p1066_p0), %s1206_s9, 128, %s1210_s11, %s261_s6, %s961_s0, %s961_s0, %s962_s10  }
  0x8a   : > { %p1348_p4 = scmp.ne.s32.totalorder %s1343_s13, 0 }
  0x8b   : > { %s1242_s25 = sand.u32 (!%p1348_p4), 1, %s938_s16   ;;  %p1349_p8 = scmp.ne.s32.totalorder (!%p1348_p4), %s1334_s27, 0 }
  0x8c   : > { %284 = sbr.rel (%p1348_p4) target bundleno = 203 (0xcb), region = 36  ;;  %s623_s23 = sshll.u32 (!%p1348_p4), %s1242_s25, 4 }
  0x8d   : > { %s287_s1 = scalar_lea.sflag (!%p1348_p4), [#allocation3], %s1242_s25  ;;  %s290_s8 = scalar_lea.vmem (!%p1348_p4), [#allocation2], %s623_s23 }
  0x93   : > { %917 = dma.done.wait (%p1349_p8), %s287_s1, 256  }
  0x94   : > { %919 = vsyncadd (%p1349_p8), %s287_s1, 4294967040  ;;  %s295_s5 = sand.u32 1, %s1022_s21   ;;  %s299_s13 = scalar_lea.vmem [#allocation5], %s623_s23 }
  0x95   : > { %s296_s0 = scalar_lea.sflag [#allocation6], %s295_s5 }
  0x96   : > { %921 = dma.done.wait (%p1349_p8), %s296_s0, 384  }
  0x97   : > { %923 = vsyncadd (%p1349_p8), %s296_s0, 4294966912  ;;  %s1256_s10 = sshll.u32 %s1242_s25, 3  ;;  %s314_s11 = scalar_lea.sflag [#allocation9], %s1242_s25 }
  0x98   : > { %s308_s9 = scalar_lea.vmem [#allocation7], %s1256_s10  ;;  %s317_s6 = scalar_lea.vmem [#allocation8], %s1256_s10 }
  0x99   : > { %925 = dma.done.wait (%p1349_p8), %s314_s11, 128  }
  0x9a   : > { %927 = vsyncadd (%p1349_p8), %s314_s11, 4294967168  ;;  %v370_v0 = vld [vmem:[%s290_s8] sm:$0xff]  ;;  %v371_v1 = vld [vmem:[%s290_s8 + $0x8] sm:$0xff]  ;;  %v964_v53 = vmov 0.0   ;;  %s631_s21 = sshll.u32 %s946_s18, 7  ;;  %s356_s27 = scalar_lea.vmem [#allocation10], %s1256_s10 }
  0x9b   : > { %v372_v2 = vld [vmem:[%s299_s13] sm:$0xff]  ;;  %728 = vlog2.f32 %v370_v0  ;;  %v394_v3 = vsub.f32 1.0, %v370_v0  ;;  %v395_v4 = vsub.f32 1.0, %v371_v1  ;;  %v373_v5 = vld [vmem:[%s299_s13 + $0x8] sm:$0xff]  ;;  %s458_s7 = sshll.u32 %s356_s27, 4  ;;  %s1270_s12 = scalar_lea.hbm %s1323_s4, %s631_s21  ;;  %s1272_s7 = int_to_ptr.vmem [resolvable:$true] %s458_s7 }
  0x9c   : > { %730 = vlog2.f32 %v371_v1  ;;  %v418_v6 = vsub.f32 1.0, %v372_v2  ;;  %v419_v7 = vsub.f32 1.0, %v373_v5  ;;  %v639_v8 = vld [vmem:[%s308_s9] sm:$0xff]   ;;  %v643_v11 = vld [vmem:[%s317_s6] sm:$0xff]   ;;  %s445_s24 = scalar_lea.sflag [#allocation4], %s1242_s25  ;;  %s864_s26 = scalar_lea.vmem %s1272_s7, 128 }
  0x9d   : > { %732 = vlog2.f32 %v394_v3  ;;  %v640_v10 = vunpack.c.l.bf16 %v639_v8  ;;  %v641_v12 = vunpack.c.h.bf16 %v639_v8  ;;  %v644_v16 = vunpack.c.l.bf16 %v643_v11  ;;  %p865_p0 = scmp.ne.s32.totalorder %s1272_s7, %s864_s26  ;;  %p1350_p1 = scmp.ne.s32.totalorder %s1335_s28, 0 }
  0x9e   : > { %734 = vlog2.f32 %v395_v4  ;;  %v645_v17 = vunpack.c.h.bf16 %v643_v11  ;;  %s965_s18 = smov [#allocation10]  }
  0x9f   : > { %736 = vlog2.f32 %v372_v2  ;;  %v404_v22 = vsub.f32 1.0, %v640_v10  ;;  %v405_v26 = vsub.f32 1.0, %v641_v12  ;;  %v428_v33 = vsub.f32 1.0, %v644_v16  ;;  %p866_p6 = pnand %p865_p0, %p1350_p1  ;;  %s868_s22 = sshll.u32 %s965_s18, 4  ;;  %s869_s22 = int_to_ptr.vmem [resolvable:$false] %s868_s22 }
  0xa0   : > { %738 = vlog2.f32 %v373_v5  ;;  %v429_v34 = vsub.f32 1.0, %v645_v17  ;;  %vm382_vm0 = vcmp.eq.f32.partialorder %v640_v10, 1.0  ;;  %vm383_vm1 = vcmp.eq.f32.partialorder %v641_v12, 1.0  ;;  %s870_s23 = scalar_lea.vmem %s869_s22, 256  ;;  %p871_p11 = scmp.lt.s32.totalorder %s1272_s7, %s869_s22 }
  0xa1   : > { %740 = vlog2.f32 %v418_v6  ;;  %v628_v54 = vsel %vm382_vm0, 1.0, %v964_v53  ;;  %v629_v56 = vsel %vm383_vm1, 1.0, %v964_v53  ;;  %p867_p13 = pneg %p866_p6  ;;  %p872_p2 = scmp.lt.s32.totalorder %s870_s23, %s864_s26 }
  0xa2   : > { %742 = vlog2.f32 %v419_v7 }
  0xa3   : > { %p873_p5 = por %p872_p2, %p871_p11 }
  0xa5   : > { %v729_v9 = vpop.eup %728  ;;  %p874_p7 = pnand %p873_p5, %p867_p13 }
  0xa6   : > { %v389_v13 = vmul.f32 0.6931472, %v729_v9  ;;  %v731_v14 = vpop.eup %730 }
  0xa7   : > { %v733_v15 = vpop.eup %732  ;;  %v391_v18 = vmul.f32 0.6931472, %v731_v14 }
  0xa8   : > { %v735_v19 = vpop.eup %734  ;;  %v392_v20 = vmax.f32 %v389_v13, -100.0  ;;  %v397_v21 = vmul.f32 0.6931472, %v733_v15 }
  0xa9   : > { %v737_v23 = vpop.eup %736  ;;  %v393_v24 = vmax.f32 %v391_v18, -100.0  ;;  %v399_v25 = vmul.f32 0.6931472, %v735_v19 }
  0xaa   : > { %v739_v27 = vpop.eup %738  ;;  %v400_v28 = vmax.f32 %v397_v21, -100.0  ;;  %v413_v29 = vmul.f32 0.6931472, %v737_v23  ;;  %v402_v36 = vmul.f32 %v640_v10, %v392_v20 }
  0xab   : > { %v741_v30 = vpop.eup %740  ;;  %v401_v31 = vmax.f32 %v399_v25, -100.0  ;;  %v415_v32 = vmul.f32 0.6931472, %v739_v27  ;;  %v403_v40 = vmul.f32 %v641_v12, %v393_v24 }
  0xac   : > { %v743_v35 = vpop.eup %742  ;;  %v406_v37 = vmul.f32 %v404_v22, %v400_v28  ;;  %v416_v38 = vmax.f32 %v413_v29, -100.0  ;;  %v421_v39 = vmul.f32 0.6931472, %v741_v30 }
  0xad   : > { %v407_v41 = vmul.f32 %v405_v26, %v401_v31  ;;  %v417_v42 = vmax.f32 %v415_v32, -100.0  ;;  %v423_v43 = vmul.f32 0.6931472, %v743_v35 }
  0xae   : > { %v424_v44 = vmax.f32 %v421_v39, -100.0  ;;  %v426_v45 = vmul.f32 %v644_v16, %v416_v38  ;;  %v408_v48 = vadd.f32 %v406_v37, %v402_v36 }
  0xaf   : > { %v425_v46 = vmax.f32 %v423_v43, -100.0  ;;  %v427_v47 = vmul.f32 %v645_v17, %v417_v42  ;;  %v409_v50 = vadd.f32 %v407_v41, %v403_v40 }
  0xb0   : > { %v430_v49 = vmul.f32 %v428_v33, %v424_v44  ;;  %v410_v57 = vsub.f32 0.0, %v408_v48 }
  0xb1   : > { %v431_v51 = vmul.f32 %v429_v34, %v425_v46  ;;  %v411_v59 = vsub.f32 0.0, %v409_v50 }
  0xb2   : > { %v432_v52 = vadd.f32 %v430_v49, %v426_v45 }
  0xb3   : > { %v433_v55 = vadd.f32 %v431_v51, %v427_v47 }
  0xb4   : > { %v434_v58 = vsub.f32 0.0, %v432_v52 }
  0xb5   : > { %v435_v60 = vsub.f32 0.0, %v433_v55 }
  0xb6   : > { %v436_v61 = vmul.f32 %v628_v54, %v434_v58 }
  0xb7   : > { %v437_v62 = vmul.f32 %v629_v56, %v435_v60 }
  0xb8   : > { %v438_v63 = vadd.f32 %v436_v61, %v410_v57 }
  0xb9   : > { %v439_v0 = vadd.f32 %v437_v62, %v411_v59 }
  0xbb   : > { %v441_v1 = vadd.f32 %v439_v0, %v438_v63 }
  0xbd   : > { %443 = vst [vmem:[%s356_s27] sm:$0xff] %v441_v1 }
  0xbe   : > { %877 = shalt.err (!%p874_p7)
}
  0xbf   : > { %s878_s25 = scalar_lea.hbm %s1270_s12, 128  ;;  %s882_s5 = scalar_lea.hbm %s1323_s4, 256 }
  0xc0   : > { %p879_p3 = scmp.ne.s32.totalorder %s1270_s12, %s878_s25  ;;  %p883_p12 = scmp.lt.u32.totalorder %s1270_s12, %s1323_s4 }
  0xc1   : > { %p884_p4 = scmp.lt.u32.totalorder %s882_s5, %s878_s25  ;;  %p886_p0 = scmp.lt.u32.totalorder %s878_s25, %s1270_s12 }
  0xc2   : > { %p880_p10 = pnand %p879_p3, %p1350_p1 }
  0xc3   : > { %p885_p8 = por %p884_p4, %p883_p12 }
  0xc4   : > { %p881_p9 = pneg %p880_p10 }
  0xc5   : > { %p887_p6 = por %p886_p0, %p885_p8 }
  0xc7   : > { %p888_p13 = pnand %p887_p6, %p881_p9 }
  0xc9   : > { %891 = shalt.err (!%p888_p13)
}
  0xca   : > { %654 = dma.vmem_to_hbm [thread:$0]  (%p1350_p1), %s1272_s7, 128, %s1270_s12, %s445_s24  }
  0xcb PF: > { %s470_s10 = sand.u32 1, %s934_s15   ;;  %p1351_p11 = scmp.ne.s32.totalorder %s1337_s30, 0 }
  0xcc   : > { %p1352_p2 = scmp.ge.s32.totalorder %s954_s20, 2  ;;  %s471_s9 = scalar_lea.sflag [#allocation4], %s470_s10 }
  0xce   : > { %p670_p5 = pnand %p1352_p2, %p1351_p11 }
  0xd0   : > { %929 = dma.done.wait (!%p670_p5), %s471_s9, 128  }
  0xd1   : > { %931 = vsyncadd (!%p670_p5), %s471_s9, 4294967168  ;;  %s26_s20 = sadd.s32 1, %s954_s20   ;;  %s1353_s28 = sld [smem:[#allocation16_spill]] }
  0xd2   : > { %p23_p7 = scmp.ge.s32.totalorder %s26_s20, 4   ;;  %s1354_s11 = sld [smem:[#allocation15_spill]] }
  0xd3   : > { %s1355_s15 = smov %s938_s16  ;;  %s1356_s16 = smov %s942_s17 }
  0xd4   : > { %s1358_s18 = smov %s950_s19  ;;  %25 = sbr.rel (!%p23_p7) target bundleno = 13 (0xd), region = 122 }
  0xd7   : > { %s1357_s17 = smov %s1353_s28 }
  0xd8   : > { %s1359_s19 = smov %s1354_s11 }
  0xdb   :  { %476 = vsyncpa [#allocation3], 1 }
  0xdc   :  { %478 = vsyncpa [#allocation3 + $0x1], 1 }
  0xdd   :  { %479 = vsyncpa [#allocation6], 1 }
  0xde   :  { %481 = vsyncpa [#allocation6 + $0x1], 1 }
  0xdf   :  { %482 = vsyncpa [#allocation9], 1 }
  0xe0   :  { %484 = vsyncpa [#allocation9 + $0x1], 1 }
  0xe1   :  { %485 = vsyncpa [#allocation4], 1 }
  0xe2   :  { %487 = vsyncpa [#allocation4 + $0x1], 1 }

</bundles_post_ra>
